<compile_context>
chip_gen: v7x
topology: tpu7x:2x2x1
jax: 0.10.0
libtpu: 0.0.40
codegen_flags: <defaults>
</compile_context>

<pallas_src>
import functools

import jax
import jax.numpy as jnp
from jax.experimental import pallas as pl
from jax.experimental.pallas import tpu as pltpu

LANE = 128      # fast (lane) axis width of a vreg
SUBLANE = 8     # slow (sublane) axis width of a vreg


def _round_up(x, m):
    return ((x + m - 1) // m) * m


def prepare_linear_params(weight, bias):
    """One-time parameter prep (do NOT call per forward).

    weight: (D_out, D_in) f32, PyTorch layout.
    bias:   (D_out,) f32.

    Returns:
      w_t:  (D_in, D_out_padded)  -- transposed, output axis zero-padded to 128-multiple
      b2:   (1,    D_out_padded)  -- zero-padded bias, kept 2D for TPU layout
    """
    d_out, d_in = weight.shape
    d_out_p = _round_up(d_out, LANE)
    w_t = jnp.zeros((d_in, d_out_p), weight.dtype).at[:, :d_out].set(weight.T)
    b2 = jnp.zeros((1, d_out_p), bias.dtype).at[:, :d_out].set(bias)
    return w_t, b2


def linear_kernel(x_ref, w_ref, b_ref, o_ref):
    # x_ref: (TM, D_in) VMEM tile          (row tile, double-buffered)
    # w_ref: (D_in, D_out_p) VMEM tile     (resident across all grid steps)
    # b_ref: (1, D_out_p) VMEM tile        (resident)
    # o_ref: (TM, D_out_p) VMEM tile       (lane-dense output tile)
    acc = jnp.dot(x_ref[...], w_ref[...], preferred_element_type=jnp.float32)
    o_ref[...] = (acc + b_ref[...]).astype(o_ref.dtype)


@functools.partial(jax.jit, static_argnames=("d_out",))
def classifier_forward(x, w_t, b2, d_out):
    """x: (N, D_in) f32.  w_t/b2 come from prepare_linear_params.  Returns (N, d_out)."""
    n, d_in = x.shape
    d_out_p = w_t.shape[1]

    # Row tile: as large as reasonable (amortize grid-step overhead), but bounded
    # so the VMEM footprint (double-buffered x/out + resident W/b) stays well
    # under the v7x 64 MiB physical / 32 MiB default-scoped budget.
    tm = 512 if n >= 512 else _round_up(n, SUBLANE)
    n_pad = _round_up(n, tm)
    if n_pad != n:
        x = jnp.zeros((n_pad, d_in), x.dtype).at[:n, :].set(x)

    # VMEM budget: x and out are double-buffered per tile; W/b are resident
    # (count x2 conservatively). 4 MiB headroom, clamped to 48 MiB (< v7x 64 MiB).
    bytes_f32 = 4
    vmem_need = 2 * bytes_f32 * (tm * d_in + d_in * d_out_p + d_out_p + tm * d_out_p)
    vmem_limit = min(vmem_need + (4 << 20), 48 << 20)

    out_p = pl.pallas_call(
        linear_kernel,
        out_shape=jax.ShapeDtypeStruct((n_pad, d_out_p), x.dtype),
        grid_spec=pltpu.PrefetchScalarGridSpec(
            num_scalar_prefetch=0,
            grid=(n_pad // tm,),
            in_specs=[
                pl.BlockSpec((tm, d_in), lambda i: (i, 0)),        # row tile of x
                pl.BlockSpec((d_in, d_out_p), lambda i: (0, 0)),   # W resident
                pl.BlockSpec((1, d_out_p), lambda i: (0, 0)),      # b resident
            ],
            out_specs=pl.BlockSpec((tm, d_out_p), lambda i: (i, 0)),
        ),
        compiler_params=pltpu.CompilerParams(
            dimension_semantics=("parallel",),   # lets v7x shard row tiles over 2 TCs
            vmem_limit_bytes=vmem_limit,
        ),
    )(x, w_t, b2)

    # Strip the row padding and the lane padding of the output feature axis.
    return out_p[:n, :d_out]


if __name__ == "__main__":
    # Small shapes consistent with the module: a batch of node-feature rows.
    N = 8            # number of nodes / rows
    INPUT_DIM = 32   # node_features.shape[1]
    OUTPUT_DIM = 4   # number of classes

    key = jax.random.PRNGKey(0)
    kx, kw, kb = jax.random.split(key, 3)

    x = jax.random.normal(kx, (N, INPUT_DIM), dtype=jnp.float32)
    # Deterministic parameter init (mimics nn.Linear's uniform(-1/sqrt(fan_in), 1/sqrt(fan_in)))
    bound = 1.0 / (INPUT_DIM ** 0.5)
    weight = jax.random.uniform(kw, (OUTPUT_DIM, INPUT_DIM), jnp.float32, -bound, bound)
    bias = jax.random.uniform(kb, (OUTPUT_DIM,), jnp.float32, -bound, bound)

    # One-time parameter prep (transpose + lane padding) outside the hot path.
    w_t, b2 = prepare_linear_params(weight, bias)

    out = classifier_forward(x, w_t, b2, OUTPUT_DIM)
    out = jax.block_until_ready(out)

    # Correctness check against plain-JAX reference of the PyTorch semantics.
    ref = x @ weight.T + bias
    assert out.shape == (N, OUTPUT_DIM)
    assert jnp.allclose(out, ref, atol=1e-5, rtol=1e-5)

    print("KERNEL_OK")
</pallas_src>

<mosaic_0001>
module attributes {stable_mosaic.version = 11 : i64} {
  func.func @linear_kernel(%arg0: i32, %arg1: memref<8x32xf32, #tpu.memory_space<vmem>>, %arg2: memref<32x128xf32, #tpu.memory_space<vmem>>, %arg3: memref<1x128xf32, #tpu.memory_space<vmem>>, %arg4: memref<8x128xf32, #tpu.memory_space<vmem>>) attributes {dimension_semantics = [#tpu.dimension_semantics<parallel>], iteration_bounds = array<i64: 1>, scalar_prefetch = 0 : i64, scratch_operands = 0 : i64, tpu.core_type = #tpu.core_type<tc>, window_params = [{transform_indices = @transform_0, window_bounds = array<i64: 8, 32>}, {pipeline_mode = #tpu.pipeline_mode<synchronous>, transform_indices = @transform_1, window_bounds = array<i64: 32, 128>}, {pipeline_mode = #tpu.pipeline_mode<synchronous>, transform_indices = @transform_2, window_bounds = array<i64: 1, 128>}, {transform_indices = @transform_3, window_bounds = array<i64: 8, 128>}]} {
    %c0 = arith.constant 0 : index
    %c0_0 = arith.constant 0 : index
    %0 = vector.load %arg1[%c0, %c0_0] : memref<8x32xf32, #tpu.memory_space<vmem>>, vector<8x32xf32>
    %c0_1 = arith.constant 0 : index
    %c0_2 = arith.constant 0 : index
    %1 = vector.load %arg2[%c0_1, %c0_2] : memref<32x128xf32, #tpu.memory_space<vmem>>, vector<32x128xf32>
    %cst = arith.constant dense<0.000000e+00> : vector<8x128xf32>
    %2 = tpu.matmul %0, %1, %cst {dimension_numbers = #tpu.dot_dimension_numbers<[1], [0], [0], [1], [0, 0, 1, 1], [], []>} : vector<8x32xf32>, vector<32x128xf32>, vector<8x128xf32> -> vector<8x128xf32>
    %c0_3 = arith.constant 0 : index
    %c0_4 = arith.constant 0 : index
    %3 = vector.load %arg3[%c0_3, %c0_4] : memref<1x128xf32, #tpu.memory_space<vmem>>, vector<1x128xf32>
    %4 = vector.broadcast %3 : vector<1x128xf32> to vector<8x128xf32>
    %5 = arith.addf %2, %4 : vector<8x128xf32>
    %c0_5 = arith.constant 0 : index
    %c0_6 = arith.constant 0 : index
    %6 = vector.load %arg4[%c0_5, %c0_6] : memref<8x128xf32, #tpu.memory_space<vmem>>, vector<8x128xf32>
    tpu.vector_store %arg4[%c0_5, %c0_6], %5 {strides = array<i32>} : memref<8x128xf32, #tpu.memory_space<vmem>>, vector<8x128xf32>,
    return
  }
  func.func @transform_0(%arg0: i32) -> (i32, i32) {
    %c0_i32 = arith.constant 0 : i32
    %c0_i32_0 = arith.constant 0 : i32
    return %arg0, %c0_i32 : i32, i32
  }
  func.func @transform_1(%arg0: i32) -> (i32, i32) {
    %c0_i32 = arith.constant 0 : i32
    %c0_i32_0 = arith.constant 0 : i32
    %c0_i32_1 = arith.constant 0 : i32
    return %c0_i32, %c0_i32_0 : i32, i32
  }
  func.func @transform_2(%arg0: i32) -> (i32, i32) {
    %c0_i32 = arith.constant 0 : i32
    %c0_i32_0 = arith.constant 0 : i32
    %c0_i32_1 = arith.constant 0 : i32
    return %c0_i32, %c0_i32_0 : i32, i32
  }
  func.func @transform_3(%arg0: i32) -> (i32, i32) {
    %c0_i32 = arith.constant 0 : i32
    %c0_i32_0 = arith.constant 0 : i32
    return %arg0, %c0_i32 : i32, i32
  }
}

</mosaic_0001>

<bundles_post_ra>
// kernel: classifier_forward.1
= control target key start
LH: loop header
LB: loop body
LE: loop exit
PB: predicated region body
PF: predicated region fallthrough
CT: control target
= control target key end

     0   :  { %8 = vsyncpa [#allocation3], 0  ;;  %s276_s0 = inlined_call_operand.hbm [shape: f32[8,32], index: 0, kind: input, shape index: {}]   ;;  %s277_s1 = inlined_call_operand.hbm [shape: f32[32,128], index: 1, kind: input, shape index: {}]   ;;  %s278_s2 = inlined_call_operand.vmem [shape: f32[1,128], index: 2, kind: input, shape index: {}]   ;;  %s279_s3 = inlined_call_operand.vmem [shape: f32[8,128], index: 3, kind: output, shape index: {}]  }
   0x1   :  { %9 = vsyncpa [#allocation5], 0  ;;  %s212_s12 = smov [#allocation2]   ;;  %s213_s14 = smov [#allocation4]  }
   0x2   :  { %s16_s13 = sshll.u32 %s212_s12, 4  ;;  %s25_s15 = sshll.u32 %s213_s14, 4  ;;  %s17_s13 = int_to_ptr.vmem [resolvable:$true] %s16_s13  ;;  %s239_s15 = int_to_ptr.vmem [resolvable:$true] %s25_s15 }
   0x3   :  { %s164_s18 = scalar_lea.hbm %s276_s0, 128 }
   0x4   :  { %p165_p0 = scmp.ne.s32.totalorder %s276_s0, %s164_s18  ;;  %p168_p1 = scmp.lt.u32.totalorder %s164_s18, %s276_s0 }
   0x6   :  { %p170_p2 = pnand %p168_p1, %p165_p0 }
   0x8   :  { %173 = shalt.err (!%p170_p2)
}
   0x9   :  { %s174_s23 = scalar_lea.vmem %s17_s13, 128  ;;  %p179_p4 = scmp.lt.s32.totalorder %s17_s13, %s17_s13 }
   0xa   :  { %p175_p3 = scmp.ne.s32.totalorder %s17_s13, %s174_s23  ;;  %p180_p5 = scmp.lt.s32.totalorder %s174_s23, %s174_s23 }
   0xc   :  { %p181_p6 = por %p180_p5, %p179_p4 }
   0xe   :  { %p182_p7 = pnand %p181_p6, %p175_p3 }
  0x10   :  { %185 = shalt.err (!%p182_p7)
}
  0x11   :  { %19 = dma.hbm_to_vmem [thread:$0]  %s276_s0, 128, %s17_s13, [#allocation3]  }
  0x12   :  { %s186_s28 = scalar_lea.hbm %s277_s1, 512 }
  0x13   :  { %p187_p8 = scmp.ne.s32.totalorder %s277_s1, %s186_s28  ;;  %p190_p9 = scmp.lt.u32.totalorder %s186_s28, %s277_s1 }
  0x15   :  { %p192_p10 = pnand %p190_p9, %p187_p8 }
  0x17   :  { %195 = shalt.err (!%p192_p10)
}
  0x18   :  { %s196_s6 = scalar_lea.vmem %s239_s15, 512  ;;  %p201_p12 = scmp.lt.s32.totalorder %s239_s15, %s239_s15 }
  0x19   :  { %p197_p11 = scmp.ne.s32.totalorder %s239_s15, %s196_s6  ;;  %p202_p13 = scmp.lt.s32.totalorder %s196_s6, %s196_s6 }
  0x1b   :  { %p203_p0 = por %p202_p13, %p201_p12 }
  0x1d   :  { %p204_p1 = pnand %p203_p0, %p197_p11 }
  0x1f   :  { %207 = shalt.err (!%p204_p1)
}
  0x20   :  { %s214_s0 = smov 128   ;;  %s215_s7 = smov 8  }
  0x21   :  { %31 = dma.hbm_to_vmem [thread:$0]  %s277_s1, 512, %s239_s15, [#allocation5], %s214_s0, %s214_s0, %s215_s7  }
  0x22   :  { %208 = dma.done.wait [#allocation3], 128  }
  0x23   :  { %209 = vsyncadd [#allocation3], 4294967168 }
  0x24   :  { %210 = dma.done.wait [#allocation5], 512  }
  0x25   :  { %211 = vsyncadd [#allocation5], 4294966784  ;;  %v216_v0 = vmov 0.0|0.0   ;;  %vm217_vm0 = vmmov 0   ;;  %v218_v1 = vmov 0.0   ;;  %v41_v2 = vld [vmem:[#allocation4] sm:$0xff] }
  0x26   :  { %151 = vmatprep.subr.bf16.mxu0 %v216_v0  ;;  %148 = vmatprep.mubr.msk.f32.mxu0 %vm217_vm0, %v218_v1  ;;  %v42_v3 = vld [vmem:[#allocation4 + $0x8] sm:$0xff]  ;;  %v43_v4 = vld [vmem:[#allocation4 + $0x10] sm:$0xff]  ;;  %v44_v6 = vld [vmem:[#allocation4 + $0x18] sm:$0xff]  ;;  %vm52_vm1 = vcmask 261120  }
  0x27   :  { %v152_v5 = vpack.c.bf16 %v42_v3, %v41_v2  ;;  %v155_v7 = vpack.c.bf16 %v44_v6, %v43_v4  ;;  %v40_v8 = vld [vmem:[#allocation2] sm:$0xff] }
  0x28   :  { %v133_v9 = vld [vmem:[%s278_s2] ss:$0 sm:$0xff] }
  0x29   :  { %153 = vmatpush3.bf16.msra.mxu0 %v152_v5 }
  0x2a   :  { %154 = vmatprep.subr.bf16.mxu0 %v216_v0 }
  0x2d   :  { %156 = vmatpush3.bf16.msra.mxu0 %v155_v7 }
  0x30   :  { %149 = vmatmul.mubr.msk.f32.vlgmr.msra.gmra.mrb[0].mxu0 %vm52_vm1, %v40_v8 }
 0x103   :  { %v122_v10 = vpop.f32.mrb[0].mxu0 }
 0x104   :  { %v123_v11 = vadd.f32 %v133_v9, %v122_v10  ;;  %v150_v12 = vpop.f32.mrb[1].mxu0 }
 0x106   :  { %126 = vst [vmem:[%s279_s3] sm:$0xff] %v123_v11 }
 0x107   :  { %131 = vsyncpa [#allocation3], 1 }
 0x108   :  { %132 = vsyncpa [#allocation5], 1 }

</bundles_post_ra>
